<compile_context>
chip_gen: v7x
topology: tpu7x:2x2x1
jax: 0.10.0
libtpu: 0.0.40
codegen_flags: <defaults>
</compile_context>

<pallas_src>
import functools

import jax
import jax.numpy as jnp
from jax import lax
from jax.experimental import pallas as pl
from jax.experimental.pallas import tpu as pltpu

HIDDEN_SIZE = 2
INPUT_SIZE = 5
NUM_CLASSES = 1
NUM_LAYERS = 1   # single layer; kernel implements exactly one LSTM layer
FC1_SIZE = 128


def _small_rows_matmul(a, w):
    """(B, K) @ (K, N) via K VPU broadcast-MACs (K small & static).

    Avoids an MXU push for tiny contraction dims; stays entirely on the VPU,
    which is what we want inside / next to the serial recurrence.
    """
    k = w.shape[0]
    acc = a[:, 0:1] * w[0:1, :]
    for r in range(1, k):
        acc = acc + a[:, r:r + 1] * w[r:r + 1, :]
    return acc


def _lstm1_kernel(x_ref, wih_ref, whh_ref, b_ref, w1_ref, b1_ref,
                  w2_ref, b2_ref, out_ref, *, B, T):
    # x_ref:   (B*T, I)   batch-first rows, row b*T + t is (batch b, time t)
    # wih_ref: (I, 4H)    input->gates weights (i, f, g, o order, like torch)
    # whh_ref: (H, 4H)    hidden->gates weights
    # b_ref:   (1, 4H)    bias_ih + bias_hh combined
    # w1_ref:  (H, 128), b1_ref: (1, 128)   fc_1 (pre-transposed to (in, out))
    # w2_ref:  (C, 128),  b2_ref: (1, C)    fc (torch orientation)
    # out_ref: (B, C)
    H = whh_ref.shape[0]

    # --- hoisted input projection: one MXU matmul for all timesteps -------
    proj = (jnp.dot(x_ref[...], wih_ref[...],
                    preferred_element_type=jnp.float32)
            + b_ref[...])                                   # (B*T, 4H)

    whh = whh_ref[...]                                      # (H, 4H)
    whh_rows = [whh[r:r + 1, :] for r in range(H)]          # each (1, 4H)

    h = jnp.zeros((B, H), jnp.float32)
    c = jnp.zeros((B, H), jnp.float32)

    # --- fully unrolled recurrence (T is static) ---------------------------
    for t in range(T):
        # rows {b*T + t} of proj -> (B, 4H); static slices, independent of the
        # carry, so they sit off the serial critical path.
        gx = jnp.concatenate(
            [proj[b * T + t:b * T + t + 1, :] for b in range(B)], axis=0)

        # recurrent term on the VPU: no per-step MXU push/pop in the chain
        rec = h[:, 0:1] * whh_rows[0]
        for r in range(1, H):
            rec = rec + h[:, r:r + 1] * whh_rows[r]

        gates = gx + rec                                    # (B, 4H)
        sig = jax.nn.sigmoid(gates)                         # one EUP pass (i,f,o)
        th = jnp.tanh(gates)                                # one EUP pass (g)
        i_g = sig[:, 0 * H:1 * H]
        f_g = sig[:, 1 * H:2 * H]
        g_g = th[:, 2 * H:3 * H]
        o_g = sig[:, 3 * H:4 * H]
        c = f_g * c + i_g * g_g
        h = o_g * jnp.tanh(c)

    # --- head: hn -> ReLU -> fc_1 -> ReLU -> fc -----------------------------
    hn = jnp.maximum(h, 0.0)                                # ReLU
    z1 = _small_rows_matmul(hn, w1_ref[...]) + b1_ref[...]  # (B, 128) on VPU
    z1 = jnp.maximum(z1, 0.0)                               # ReLU

    w2 = w2_ref[...]                                        # (C, 128)
    if w2.shape[0] == 1:
        # N=1 head: lane reduction instead of a heavily masked MXU matmul.
        out = jnp.sum(z1 * w2, axis=-1, keepdims=True) + b2_ref[...]
    else:
        out = lax.dot_general(z1, w2, (((1,), (1,)), ((), ())),
                              preferred_element_type=jnp.float32) + b2_ref[...]
    # TODO(synk): (B, 1) output is a masked lane store; widen/pad the output
    # slab if this ever runs at production batch sizes.
    out_ref[...] = out.astype(out_ref.dtype)


@jax.jit
def lstm1_forward(x, params):
    """x: (B, T, input_size) float32, batch-first like the PyTorch module."""
    B, T, I = x.shape
    C = params["w_fc"].shape[0]

    # Row-major collapse (B, T, I) -> (B*T, I): free in XLA (no transpose, no
    # extra HBM round trip), and lets the kernel run a single projection matmul.
    x2d = x.reshape(B * T, I)

    # Problem is tiny (everything fits in a few vregs), so no grid / tiling.
    # TODO(synk): if B or T scale up, add a batch grid (dimension_semantics=
    # ("parallel",)), carry h/c in VMEM scratch, and size tiles against
    # pltpu.get_tpu_info().vmem_capacity_bytes (64 MiB/TC on v7x).
    vmem = pl.BlockSpec(memory_space=pltpu.MemorySpace.VMEM)
    kernel = functools.partial(_lstm1_kernel, B=B, T=T)

    out = pl.pallas_call(
        kernel,
        out_shape=jax.ShapeDtypeStruct((B, C), jnp.float32),
        in_specs=[vmem] * 8,
        out_specs=vmem,
    )(
        x2d,
        params["w_ih_t"],
        params["w_hh_t"],
        params["b_gates"],
        params["w_fc1_t"],
        params["b_fc1"],
        params["w_fc"],
        params["b_fc"],
    )
    return out  # (B, num_classes)


def init_params(key, input_size=INPUT_SIZE, hidden_size=HIDDEN_SIZE,
                num_classes=NUM_CLASSES):
    """Deterministic init mimicking PyTorch default uniform(-1/sqrt(fan), +)."""
    ks = jax.random.split(key, 8)
    k_lstm = 1.0 / jnp.sqrt(hidden_size)
    k_fc1 = 1.0 / jnp.sqrt(hidden_size)
    k_fc = 1.0 / jnp.sqrt(float(FC1_SIZE))

    w_ih = jax.random.uniform(ks[0], (4 * hidden_size, input_size),
                              jnp.float32, -k_lstm, k_lstm)
    w_hh = jax.random.uniform(ks[1], (4 * hidden_size, hidden_size),
                              jnp.float32, -k_lstm, k_lstm)
    b_ih = jax.random.uniform(ks[2], (4 * hidden_size,), jnp.float32,
                              -k_lstm, k_lstm)
    b_hh = jax.random.uniform(ks[3], (4 * hidden_size,), jnp.float32,
                              -k_lstm, k_lstm)
    w_fc1 = jax.random.uniform(ks[4], (FC1_SIZE, hidden_size), jnp.float32,
                               -k_fc1, k_fc1)
    b_fc1 = jax.random.uniform(ks[5], (FC1_SIZE,), jnp.float32, -k_fc1, k_fc1)
    w_fc = jax.random.uniform(ks[6], (num_classes, FC1_SIZE), jnp.float32,
                              -k_fc, k_fc)
    b_fc = jax.random.uniform(ks[7], (num_classes,), jnp.float32, -k_fc, k_fc)

    return {
        # pre-transposed to (in, out) where the kernel does row-major matmuls
        "w_ih_t": jnp.transpose(w_ih),                      # (I, 4H)
        "w_hh_t": jnp.transpose(w_hh),                      # (H, 4H)
        "b_gates": (b_ih + b_hh)[None, :],                  # (1, 4H)
        "w_fc1_t": jnp.transpose(w_fc1),                    # (H, 128)
        "b_fc1": b_fc1[None, :],                            # (1, 128)
        # fc kept in torch (C, 128) orientation for the lane-reduction head
        "w_fc": w_fc,                                       # (C, 128)
        "b_fc": b_fc[None, :],                              # (1, C)
    }


if __name__ == "__main__":
    key = jax.random.PRNGKey(0)
    k_param, k_x = jax.random.split(key)

    batch, seq_len = 2, 8
    params = init_params(k_param)
    x = jax.random.normal(k_x, (batch, seq_len, INPUT_SIZE), jnp.float32)

    out = lstm1_forward(x, params)
    jax.block_until_ready(out)
    assert out.shape == (batch, NUM_CLASSES)
    print("KERNEL_OK")
</pallas_src>

<mosaic_0001>
module attributes {stable_mosaic.version = 11 : i64} {
  func.func @_lstm1_kernel(%arg0: memref<16x5xf32, #tpu.memory_space<vmem>>, %arg1: memref<5x8xf32, #tpu.memory_space<vmem>>, %arg2: memref<2x8xf32, #tpu.memory_space<vmem>>, %arg3: memref<1x8xf32, #tpu.memory_space<vmem>>, %arg4: memref<2x128xf32, #tpu.memory_space<vmem>>, %arg5: memref<1x128xf32, #tpu.memory_space<vmem>>, %arg6: memref<1x128xf32, #tpu.memory_space<vmem>>, %arg7: memref<1x1xf32, #tpu.memory_space<vmem>>, %arg8: memref<2x1xf32, #tpu.memory_space<vmem>>) attributes {dimension_semantics = [], scalar_prefetch = 0 : i64, scratch_operands = 0 : i64, tpu.core_type = #tpu.core_type<tc>} {
    %c0 = arith.constant 0 : index
    %c0_0 = arith.constant 0 : index
    %0 = vector.load %arg0[%c0, %c0_0] : memref<16x5xf32, #tpu.memory_space<vmem>>, vector<16x5xf32>
    %c0_1 = arith.constant 0 : index
    %c0_2 = arith.constant 0 : index
    %1 = vector.load %arg1[%c0_1, %c0_2] : memref<5x8xf32, #tpu.memory_space<vmem>>, vector<5x8xf32>
    %cst = arith.constant dense<0.000000e+00> : vector<16x8xf32>
    %2 = tpu.matmul %0, %1, %cst {dimension_numbers = #tpu.dot_dimension_numbers<[1], [0], [0], [1], [0, 0, 1, 1], [], []>} : vector<16x5xf32>, vector<5x8xf32>, vector<16x8xf32> -> vector<16x8xf32>
    %c0_3 = arith.constant 0 : index
    %c0_4 = arith.constant 0 : index
    %3 = vector.load %arg3[%c0_3, %c0_4] : memref<1x8xf32, #tpu.memory_space<vmem>>, vector<1x8xf32>
    %4 = vector.broadcast %3 : vector<1x8xf32> to vector<16x8xf32>
    %5 = arith.addf %2, %4 : vector<16x8xf32>
    %c0_5 = arith.constant 0 : index
    %c0_6 = arith.constant 0 : index
    %6 = vector.load %arg2[%c0_5, %c0_6] : memref<2x8xf32, #tpu.memory_space<vmem>>, vector<2x8xf32>
    %7 = vector.extract_strided_slice %6 {offsets = [0, 0], sizes = [1, 8], strides = [1, 1]} : vector<2x8xf32> to vector<1x8xf32>
    %8 = vector.extract_strided_slice %6 {offsets = [1, 0], sizes = [1, 8], strides = [1, 1]} : vector<2x8xf32> to vector<1x8xf32>
    %cst_7 = arith.constant 0.000000e+00 : f32
    %9 = vector.broadcast %cst_7 : f32 to vector<2x2xf32>
    %cst_8 = arith.constant 0.000000e+00 : f32
    %10 = vector.broadcast %cst_8 : f32 to vector<2x2xf32>
    %11 = vector.extract_strided_slice %5 {offsets = [0, 0], sizes = [1, 8], strides = [1, 1]} : vector<16x8xf32> to vector<1x8xf32>
    %12 = vector.extract_strided_slice %5 {offsets = [8, 0], sizes = [1, 8], strides = [1, 1]} : vector<16x8xf32> to vector<1x8xf32>
    %13 = tpu.concatenate %11, %12 in 0 : vector<1x8xf32>, vector<1x8xf32> -> vector<2x8xf32>
    %14 = vector.extract_strided_slice %9 {offsets = [0, 0], sizes = [2, 1], strides = [1, 1]} : vector<2x2xf32> to vector<2x1xf32>
    %15 = vector.broadcast %14 : vector<2x1xf32> to vector<2x8xf32>
    %16 = vector.broadcast %7 : vector<1x8xf32> to vector<2x8xf32>
    %17 = arith.mulf %15, %16 : vector<2x8xf32>
    %18 = vector.extract_strided_slice %9 {offsets = [0, 1], sizes = [2, 1], strides = [1, 1]} : vector<2x2xf32> to vector<2x1xf32>
    %19 = vector.broadcast %18 : vector<2x1xf32> to vector<2x8xf32>
    %20 = vector.broadcast %8 : vector<1x8xf32> to vector<2x8xf32>
    %21 = arith.mulf %19, %20 : vector<2x8xf32>
    %22 = arith.addf %17, %21 : vector<2x8xf32>
    %23 = arith.addf %13, %22 : vector<2x8xf32>
    %24 = arith.negf %23 : vector<2x8xf32>
    %25 = math.exp %24 : vector<2x8xf32>
    %cst_9 = arith.constant 1.000000e+00 : f32
    %26 = vector.broadcast %cst_9 : f32 to vector<2x8xf32>
    %27 = arith.addf %26, %25 : vector<2x8xf32>
    %28 = arith.divf %26, %27 : vector<2x8xf32>
    %29 = math.tanh %23 : vector<2x8xf32>
    %30 = vector.extract_strided_slice %28 {offsets = [0, 0], sizes = [2, 2], strides = [1, 1]} : vector<2x8xf32> to vector<2x2xf32>
    %31 = vector.extract_strided_slice %28 {offsets = [0, 2], sizes = [2, 2], strides = [1, 1]} : vector<2x8xf32> to vector<2x2xf32>
    %32 = vector.extract_strided_slice %29 {offsets = [0, 4], sizes = [2, 2], strides = [1, 1]} : vector<2x8xf32> to vector<2x2xf32>
    %33 = vector.extract_strided_slice %28 {offsets = [0, 6], sizes = [2, 2], strides = [1, 1]} : vector<2x8xf32> to vector<2x2xf32>
    %34 = arith.mulf %31, %10 : vector<2x2xf32>
    %35 = arith.mulf %30, %32 : vector<2x2xf32>
    %36 = arith.addf %34, %35 : vector<2x2xf32>
    %37 = math.tanh %36 : vector<2x2xf32>
    %38 = arith.mulf %33, %37 : vector<2x2xf32>
    %39 = vector.extract_strided_slice %5 {offsets = [1, 0], sizes = [1, 8], strides = [1, 1]} : vector<16x8xf32> to vector<1x8xf32>
    %40 = vector.extract_strided_slice %5 {offsets = [9, 0], sizes = [1, 8], strides = [1, 1]} : vector<16x8xf32> to vector<1x8xf32>
    %41 = tpu.concatenate %39, %40 in 0 : vector<1x8xf32>, vector<1x8xf32> -> vector<2x8xf32>
    %42 = vector.extract_strided_slice %38 {offsets = [0, 0], sizes = [2, 1], strides = [1, 1]} : vector<2x2xf32> to vector<2x1xf32>
    %43 = vector.broadcast %42 : vector<2x1xf32> to vector<2x8xf32>
    %44 = vector.broadcast %7 : vector<1x8xf32> to vector<2x8xf32>
    %45 = arith.mulf %43, %44 : vector<2x8xf32>
    %46 = vector.extract_strided_slice %38 {offsets = [0, 1], sizes = [2, 1], strides = [1, 1]} : vector<2x2xf32> to vector<2x1xf32>
    %47 = vector.broadcast %46 : vector<2x1xf32> to vector<2x8xf32>
    %48 = vector.broadcast %8 : vector<1x8xf32> to vector<2x8xf32>
    %49 = arith.mulf %47, %48 : vector<2x8xf32>
    %50 = arith.addf %45, %49 : vector<2x8xf32>
    %51 = arith.addf %41, %50 : vector<2x8xf32>
    %52 = arith.negf %51 : vector<2x8xf32>
    %53 = math.exp %52 : vector<2x8xf32>
    %cst_10 = arith.constant 1.000000e+00 : f32
    %54 = vector.broadcast %cst_10 : f32 to vector<2x8xf32>
    %55 = arith.addf %54, %53 : vector<2x8xf32>
    %56 = arith.divf %54, %55 : vector<2x8xf32>
    %57 = math.tanh %51 : vector<2x8xf32>
    %58 = vector.extract_strided_slice %56 {offsets = [0, 0], sizes = [2, 2], strides = [1, 1]} : vector<2x8xf32> to vector<2x2xf32>
    %59 = vector.extract_strided_slice %56 {offsets = [0, 2], sizes = [2, 2], strides = [1, 1]} : vector<2x8xf32> to vector<2x2xf32>
    %60 = vector.extract_strided_slice %57 {offsets = [0, 4], sizes = [2, 2], strides = [1, 1]} : vector<2x8xf32> to vector<2x2xf32>
    %61 = vector.extract_strided_slice %56 {offsets = [0, 6], sizes = [2, 2], strides = [1, 1]} : vector<2x8xf32> to vector<2x2xf32>
    %62 = arith.mulf %59, %36 : vector<2x2xf32>
    %63 = arith.mulf %58, %60 : vector<2x2xf32>
    %64 = arith.addf %62, %63 : vector<2x2xf32>
    %65 = math.tanh %64 : vector<2x2xf32>
    %66 = arith.mulf %61, %65 : vector<2x2xf32>
    %67 = vector.extract_strided_slice %5 {offsets = [2, 0], sizes = [1, 8], strides = [1, 1]} : vector<16x8xf32> to vector<1x8xf32>
    %68 = vector.extract_strided_slice %5 {offsets = [10, 0], sizes = [1, 8], strides = [1, 1]} : vector<16x8xf32> to vector<1x8xf32>
    %69 = tpu.concatenate %67, %68 in 0 : vector<1x8xf32>, vector<1x8xf32> -> vector<2x8xf32>
    %70 = vector.extract_strided_slice %66 {offsets = [0, 0], sizes = [2, 1], strides = [1, 1]} : vector<2x2xf32> to vector<2x1xf32>
    %71 = vector.broadcast %70 : vector<2x1xf32> to vector<2x8xf32>
    %72 = vector.broadcast %7 : vector<1x8xf32> to vector<2x8xf32>
    %73 = arith.mulf %71, %72 : vector<2x8xf32>
    %74 = vector.extract_strided_slice %66 {offsets = [0, 1], sizes = [2, 1], strides = [1, 1]} : vector<2x2xf32> to vector<2x1xf32>
    %75 = vector.broadcast %74 : vector<2x1xf32> to vector<2x8xf32>
    %76 = vector.broadcast %8 : vector<1x8xf32> to vector<2x8xf32>
    %77 = arith.mulf %75, %76 : vector<2x8xf32>
    %78 = arith.addf %73, %77 : vector<2x8xf32>
    %79 = arith.addf %69, %78 : vector<2x8xf32>
    %80 = arith.negf %79 : vector<2x8xf32>
    %81 = math.exp %80 : vector<2x8xf32>
    %cst_11 = arith.constant 1.000000e+00 : f32
    %82 = vector.broadcast %cst_11 : f32 to vector<2x8xf32>
    %83 = arith.addf %82, %81 : vector<2x8xf32>
    %84 = arith.divf %82, %83 : vector<2x8xf32>
    %85 = math.tanh %79 : vector<2x8xf32>
    %86 = vector.extract_strided_slice %84 {offsets = [0, 0], sizes = [2, 2], strides = [1, 1]} : vector<2x8xf32> to vector<2x2xf32>
    %87 = vector.extract_strided_slice %84 {offsets = [0, 2], sizes = [2, 2], strides = [1, 1]} : vector<2x8xf32> to vector<2x2xf32>
    %88 = vector.extract_strided_slice %85 {offsets = [0, 4], sizes = [2, 2], strides = [1, 1]} : vector<2x8xf32> to vector<2x2xf32>
    %89 = vector.extract_strided_slice %84 {offsets = [0, 6], sizes = [2, 2], strides = [1, 1]} : vector<2x8xf32> to vector<2x2xf32>
    %90 = arith.mulf %87, %64 : vector<2x2xf32>
    %91 = arith.mulf %86, %88 : vector<2x2xf32>
    %92 = arith.addf %90, %91 : vector<2x2xf32>
    %93 = math.tanh %92 : vector<2x2xf32>
    %94 = arith.mulf %89, %93 : vector<2x2xf32>
    %95 = vector.extract_strided_slice %5 {offsets = [3, 0], sizes = [1, 8], strides = [1, 1]} : vector<16x8xf32> to vector<1x8xf32>
    %96 = vector.extract_strided_slice %5 {offsets = [11, 0], sizes = [1, 8], strides = [1, 1]} : vector<16x8xf32> to vector<1x8xf32>
    %97 = tpu.concatenate %95, %96 in 0 : vector<1x8xf32>, vector<1x8xf32> -> vector<2x8xf32>
    %98 = vector.extract_strided_slice %94 {offsets = [0, 0], sizes = [2, 1], strides = [1, 1]} : vector<2x2xf32> to vector<2x1xf32>
    %99 = vector.broadcast %98 : vector<2x1xf32> to vector<2x8xf32>
    %100 = vector.broadcast %7 : vector<1x8xf32> to vector<2x8xf32>
    %101 = arith.mulf %99, %100 : vector<2x8xf32>
    %102 = vector.extract_strided_slice %94 {offsets = [0, 1], sizes = [2, 1], strides = [1, 1]} : vector<2x2xf32> to vector<2x1xf32>
    %103 = vector.broadcast %102 : vector<2x1xf32> to vector<2x8xf32>
    %104 = vector.broadcast %8 : vector<1x8xf32> to vector<2x8xf32>
    %105 = arith.mulf %103, %104 : vector<2x8xf32>
    %106 = arith.addf %101, %105 : vector<2x8xf32>
    %107 = arith.addf %97, %106 : vector<2x8xf32>
    %108 = arith.negf %107 : vector<2x8xf32>
    %109 = math.exp %108 : vector<2x8xf32>
    %cst_12 = arith.constant 1.000000e+00 : f32
    %110 = vector.broadcast %cst_12 : f32 to vector<2x8xf32>
    %111 = arith.addf %110, %109 : vector<2x8xf32>
    %112 = arith.divf %110, %111 : vector<2x8xf32>
    %113 = math.tanh %107 : vector<2x8xf32>
    %114 = vector.extract_strided_slice %112 {offsets = [0, 0], sizes = [2, 2], strides = [1, 1]} : vector<2x8xf32> to vector<2x2xf32>
    %115 = vector.extract_strided_slice %112 {offsets = [0, 2], sizes = [2, 2], strides = [1, 1]} : vector<2x8xf32> to vector<2x2xf32>
    %116 = vector.extract_strided_slice %113 {offsets = [0, 4], sizes = [2, 2], strides = [1, 1]} : vector<2x8xf32> to vector<2x2xf32>
    %117 = vector.extract_strided_slice %112 {offsets = [0, 6], sizes = [2, 2], strides = [1, 1]} : vector<2x8xf32> to vector<2x2xf32>
    %118 = arith.mulf %115, %92 : vector<2x2xf32>
    %119 = arith.mulf %114, %116 : vector<2x2xf32>
    %120 = arith.addf %118, %119 : vector<2x2xf32>
    %121 = math.tanh %120 : vector<2x2xf32>
    %122 = arith.mulf %117, %121 : vector<2x2xf32>
    %123 = vector.extract_strided_slice %5 {offsets = [4, 0], sizes = [1, 8], strides = [1, 1]} : vector<16x8xf32> to vector<1x8xf32>
    %124 = vector.extract_strided_slice %5 {offsets = [12, 0], sizes = [1, 8], strides = [1, 1]} : vector<16x8xf32> to vector<1x8xf32>
    %125 = tpu.concatenate %123, %124 in 0 : vector<1x8xf32>, vector<1x8xf32> -> vector<2x8xf32>
    %126 = vector.extract_strided_slice %122 {offsets = [0, 0], sizes = [2, 1], strides = [1, 1]} : vector<2x2xf32> to vector<2x1xf32>
    %127 = vector.broadcast %126 : vector<2x1xf32> to vector<2x8xf32>
    %128 = vector.broadcast %7 : vector<1x8xf32> to vector<2x8xf32>
    %129 = arith.mulf %127, %128 : vector<2x8xf32>
    %130 = vector.extract_strided_slice %122 {offsets = [0, 1], sizes = [2, 1], strides = [1, 1]} : vector<2x2xf32> to vector<2x1xf32>
    %131 = vector.broadcast %130 : vector<2x1xf32> to vector<2x8xf32>
    %132 = vector.broadcast %8 : vector<1x8xf32> to vector<2x8xf32>
    %133 = arith.mulf %131, %132 : vector<2x8xf32>
    %134 = arith.addf %129, %133 : vector<2x8xf32>
    %135 = arith.addf %125, %134 : vector<2x8xf32>
    %136 = arith.negf %135 : vector<2x8xf32>
    %137 = math.exp %136 : vector<2x8xf32>
    %cst_13 = arith.constant 1.000000e+00 : f32
    %138 = vector.broadcast %cst_13 : f32 to vector<2x8xf32>
    %139 = arith.addf %138, %137 : vector<2x8xf32>
    %140 = arith.divf %138, %139 : vector<2x8xf32>
    %141 = math.tanh %135 : vector<2x8xf32>
    %142 = vector.extract_strided_slice %140 {offsets = [0, 0], sizes = [2, 2], strides = [1, 1]} : vector<2x8xf32> to vector<2x2xf32>
    %143 = vector.extract_strided_slice %140 {offsets = [0, 2], sizes = [2, 2], strides = [1, 1]} : vector<2x8xf32> to vector<2x2xf32>
    %144 = vector.extract_strided_slice %141 {offsets = [0, 4], sizes = [2, 2], strides = [1, 1]} : vector<2x8xf32> to vector<2x2xf32>
    %145 = vector.extract_strided_slice %140 {offsets = [0, 6], sizes = [2, 2], strides = [1, 1]} : vector<2x8xf32> to vector<2x2xf32>
    %146 = arith.mulf %143, %120 : vector<2x2xf32>
    %147 = arith.mulf %142, %144 : vector<2x2xf32>
    %148 = arith.addf %146, %147 : vector<2x2xf32>
    %149 = math.tanh %148 : vector<2x2xf32>
    %150 = arith.mulf %145, %149 : vector<2x2xf32>
    %151 = vector.extract_strided_slice %5 {offsets = [5, 0], sizes = [1, 8], strides = [1, 1]} : vector<16x8xf32> to vector<1x8xf32>
    %152 = vector.extract_strided_slice %5 {offsets = [13, 0], sizes = [1, 8], strides = [1, 1]} : vector<16x8xf32> to vector<1x8xf32>
    %153 = tpu.concatenate %151, %152 in 0 : vector<1x8xf32>, vector<1x8xf32> -> vector<2x8xf32>
    %154 = vector.extract_strided_slice %150 {offsets = [0, 0], sizes = [2, 1], strides = [1, 1]} : vector<2x2xf32> to vector<2x1xf32>
    %155 = vector.broadcast %154 : vector<2x1xf32> to vector<2x8xf32>
    %156 = vector.broadcast %7 : vector<1x8xf32> to vector<2x8xf32>
    %157 = arith.mulf %155, %156 : vector<2x8xf32>
    %158 = vector.extract_strided_slice %150 {offsets = [0, 1], sizes = [2, 1], strides = [1, 1]} : vector<2x2xf32> to vector<2x1xf32>
    %159 = vector.broadcast %158 : vector<2x1xf32> to vector<2x8xf32>
    %160 = vector.broadcast %8 : vector<1x8xf32> to vector<2x8xf32>
    %161 = arith.mulf %159, %160 : vector<2x8xf32>
    %162 = arith.addf %157, %161 : vector<2x8xf32>
    %163 = arith.addf %153, %162 : vector<2x8xf32>
    %164 = arith.negf %163 : vector<2x8xf32>
    %165 = math.exp %164 : vector<2x8xf32>
    %cst_14 = arith.constant 1.000000e+00 : f32
    %166 = vector.broadcast %cst_14 : f32 to vector<2x8xf32>
    %167 = arith.addf %166, %165 : vector<2x8xf32>
    %168 = arith.divf %166, %167 : vector<2x8xf32>
    %169 = math.tanh %163 : vector<2x8xf32>
    %170 = vector.extract_strided_slice %168 {offsets = [0, 0], sizes = [2, 2], strides = [1, 1]} : vector<2x8xf32> to vector<2x2xf32>
    %171 = vector.extract_strided_slice %168 {offsets = [0, 2], sizes = [2, 2], strides = [1, 1]} : vector<2x8xf32> to vector<2x2xf32>
    %172 = vector.extract_strided_slice %169 {offsets = [0, 4], sizes = [2, 2], strides = [1, 1]} : vector<2x8xf32> to vector<2x2xf32>
    %173 = vector.extract_strided_slice %168 {offsets = [0, 6], sizes = [2, 2], strides = [1, 1]} : vector<2x8xf32> to vector<2x2xf32>
    %174 = arith.mulf %171, %148 : vector<2x2xf32>
    %175 = arith.mulf %170, %172 : vector<2x2xf32>
    %176 = arith.addf %174, %175 : vector<2x2xf32>
    %177 = math.tanh %176 : vector<2x2xf32>
    %178 = arith.mulf %173, %177 : vector<2x2xf32>
    %179 = vector.extract_strided_slice %5 {offsets = [6, 0], sizes = [1, 8], strides = [1, 1]} : vector<16x8xf32> to vector<1x8xf32>
    %180 = vector.extract_strided_slice %5 {offsets = [14, 0], sizes = [1, 8], strides = [1, 1]} : vector<16x8xf32> to vector<1x8xf32>
    %181 = tpu.concatenate %179, %180 in 0 : vector<1x8xf32>, vector<1x8xf32> -> vector<2x8xf32>
    %182 = vector.extract_strided_slice %178 {offsets = [0, 0], sizes = [2, 1], strides = [1, 1]} : vector<2x2xf32> to vector<2x1xf32>
    %183 = vector.broadcast %182 : vector<2x1xf32> to vector<2x8xf32>
    %184 = vector.broadcast %7 : vector<1x8xf32> to vector<2x8xf32>
    %185 = arith.mulf %183, %184 : vector<2x8xf32>
    %186 = vector.extract_strided_slice %178 {offsets = [0, 1], sizes = [2, 1], strides = [1, 1]} : vector<2x2xf32> to vector<2x1xf32>
    %187 = vector.broadcast %186 : vector<2x1xf32> to vector<2x8xf32>
    %188 = vector.broadcast %8 : vector<1x8xf32> to vector<2x8xf32>
    %189 = arith.mulf %187, %188 : vector<2x8xf32>
    %190 = arith.addf %185, %189 : vector<2x8xf32>
    %191 = arith.addf %181, %190 : vector<2x8xf32>
    %192 = arith.negf %191 : vector<2x8xf32>
    %193 = math.exp %192 : vector<2x8xf32>
    %cst_15 = arith.constant 1.000000e+00 : f32
    %194 = vector.broadcast %cst_15 : f32 to vector<2x8xf32>
    %195 = arith.addf %194, %193 : vector<2x8xf32>
    %196 = arith.divf %194, %195 : vector<2x8xf32>
    %197 = math.tanh %191 : vector<2x8xf32>
    %198 = vector.extract_strided_slice %196 {offsets = [0, 0], sizes = [2, 2], strides = [1, 1]} : vector<2x8xf32> to vector<2x2xf32>
    %199 = vector.extract_strided_slice %196 {offsets = [0, 2], sizes = [2, 2], strides = [1, 1]} : vector<2x8xf32> to vector<2x2xf32>
    %200 = vector.extract_strided_slice %197 {offsets = [0, 4], sizes = [2, 2], strides = [1, 1]} : vector<2x8xf32> to vector<2x2xf32>
    %201 = vector.extract_strided_slice %196 {offsets = [0, 6], sizes = [2, 2], strides = [1, 1]} : vector<2x8xf32> to vector<2x2xf32>
    %202 = arith.mulf %199, %176 : vector<2x2xf32>
    %203 = arith.mulf %198, %200 : vector<2x2xf32>
    %204 = arith.addf %202, %203 : vector<2x2xf32>
    %205 = math.tanh %204 : vector<2x2xf32>
    %206 = arith.mulf %201, %205 : vector<2x2xf32>
    %207 = vector.extract_strided_slice %5 {offsets = [7, 0], sizes = [1, 8], strides = [1, 1]} : vector<16x8xf32> to vector<1x8xf32>
    %208 = vector.extract_strided_slice %5 {offsets = [15, 0], sizes = [1, 8], strides = [1, 1]} : vector<16x8xf32> to vector<1x8xf32>
    %209 = tpu.concatenate %207, %208 in 0 : vector<1x8xf32>, vector<1x8xf32> -> vector<2x8xf32>
    %210 = vector.extract_strided_slice %206 {offsets = [0, 0], sizes = [2, 1], strides = [1, 1]} : vector<2x2xf32> to vector<2x1xf32>
    %211 = vector.broadcast %210 : vector<2x1xf32> to vector<2x8xf32>
    %212 = vector.broadcast %7 : vector<1x8xf32> to vector<2x8xf32>
    %213 = arith.mulf %211, %212 : vector<2x8xf32>
    %214 = vector.extract_strided_slice %206 {offsets = [0, 1], sizes = [2, 1], strides = [1, 1]} : vector<2x2xf32> to vector<2x1xf32>
    %215 = vector.broadcast %214 : vector<2x1xf32> to vector<2x8xf32>
    %216 = vector.broadcast %8 : vector<1x8xf32> to vector<2x8xf32>
    %217 = arith.mulf %215, %216 : vector<2x8xf32>
    %218 = arith.addf %213, %217 : vector<2x8xf32>
    %219 = arith.addf %209, %218 : vector<2x8xf32>
    %220 = arith.negf %219 : vector<2x8xf32>
    %221 = math.exp %220 : vector<2x8xf32>
    %cst_16 = arith.constant 1.000000e+00 : f32
    %222 = vector.broadcast %cst_16 : f32 to vector<2x8xf32>
    %223 = arith.addf %222, %221 : vector<2x8xf32>
    %224 = arith.divf %222, %223 : vector<2x8xf32>
    %225 = math.tanh %219 : vector<2x8xf32>
    %226 = vector.extract_strided_slice %224 {offsets = [0, 0], sizes = [2, 2], strides = [1, 1]} : vector<2x8xf32> to vector<2x2xf32>
    %227 = vector.extract_strided_slice %224 {offsets = [0, 2], sizes = [2, 2], strides = [1, 1]} : vector<2x8xf32> to vector<2x2xf32>
    %228 = vector.extract_strided_slice %225 {offsets = [0, 4], sizes = [2, 2], strides = [1, 1]} : vector<2x8xf32> to vector<2x2xf32>
    %229 = vector.extract_strided_slice %224 {offsets = [0, 6], sizes = [2, 2], strides = [1, 1]} : vector<2x8xf32> to vector<2x2xf32>
    %230 = arith.mulf %227, %204 : vector<2x2xf32>
    %231 = arith.mulf %226, %228 : vector<2x2xf32>
    %232 = arith.addf %230, %231 : vector<2x2xf32>
    %233 = math.tanh %232 : vector<2x2xf32>
    %234 = arith.mulf %229, %233 : vector<2x2xf32>
    %cst_17 = arith.constant 0.000000e+00 : f32
    %235 = vector.broadcast %cst_17 : f32 to vector<2x2xf32>
    %236 = arith.maximumf %234, %235 : vector<2x2xf32>
    %c0_18 = arith.constant 0 : index
    %c0_19 = arith.constant 0 : index
    %237 = vector.load %arg4[%c0_18, %c0_19] : memref<2x128xf32, #tpu.memory_space<vmem>>, vector<2x128xf32>
    %238 = vector.extract_strided_slice %236 {offsets = [0, 0], sizes = [2, 1], strides = [1, 1]} : vector<2x2xf32> to vector<2x1xf32>
    %239 = vector.extract_strided_slice %237 {offsets = [0, 0], sizes = [1, 128], strides = [1, 1]} : vector<2x128xf32> to vector<1x128xf32>
    %240 = vector.broadcast %238 : vector<2x1xf32> to vector<2x128xf32>
    %241 = vector.broadcast %239 : vector<1x128xf32> to vector<2x128xf32>
    %242 = arith.mulf %240, %241 : vector<2x128xf32>
    %243 = vector.extract_strided_slice %236 {offsets = [0, 1], sizes = [2, 1], strides = [1, 1]} : vector<2x2xf32> to vector<2x1xf32>
    %244 = vector.extract_strided_slice %237 {offsets = [1, 0], sizes = [1, 128], strides = [1, 1]} : vector<2x128xf32> to vector<1x128xf32>
    %245 = vector.broadcast %243 : vector<2x1xf32> to vector<2x128xf32>
    %246 = vector.broadcast %244 : vector<1x128xf32> to vector<2x128xf32>
    %247 = arith.mulf %245, %246 : vector<2x128xf32>
    %248 = arith.addf %242, %247 : vector<2x128xf32>
    %c0_20 = arith.constant 0 : index
    %c0_21 = arith.constant 0 : index
    %249 = vector.load %arg5[%c0_20, %c0_21] : memref<1x128xf32, #tpu.memory_space<vmem>>, vector<1x128xf32>
    %250 = vector.broadcast %249 : vector<1x128xf32> to vector<2x128xf32>
    %251 = arith.addf %248, %250 : vector<2x128xf32>
    %cst_22 = arith.constant 0.000000e+00 : f32
    %252 = vector.broadcast %cst_22 : f32 to vector<2x128xf32>
    %253 = arith.maximumf %251, %252 : vector<2x128xf32>
    %c0_23 = arith.constant 0 : index
    %c0_24 = arith.constant 0 : index
    %254 = vector.load %arg6[%c0_23, %c0_24] : memref<1x128xf32, #tpu.memory_space<vmem>>, vector<1x128xf32>
    %255 = vector.broadcast %254 : vector<1x128xf32> to vector<2x128xf32>
    %256 = arith.mulf %253, %255 : vector<2x128xf32>
    %cst_25 = arith.constant dense<0.000000e+00> : vector<2xf32>
    %257 = vector.multi_reduction <add>, %256, %cst_25 [1] : vector<2x128xf32> to vector<2xf32>
    %258 = vector.shape_cast %257 : vector<2xf32> to vector<2x1xf32>
    %c0_26 = arith.constant 0 : index
    %c0_27 = arith.constant 0 : index
    %259 = vector.load %arg7[%c0_26, %c0_27] : memref<1x1xf32, #tpu.memory_space<vmem>>, vector<1x1xf32>
    %260 = vector.broadcast %259 : vector<1x1xf32> to vector<2x1xf32>
    %261 = arith.addf %258, %260 : vector<2x1xf32>
    %c0_28 = arith.constant 0 : index
    %c0_29 = arith.constant 0 : index
    %262 = vector.load %arg8[%c0_28, %c0_29] : memref<2x1xf32, #tpu.memory_space<vmem>>, vector<2x1xf32>
    tpu.vector_store %arg8[%c0_28, %c0_29], %261 {strides = array<i32>} : memref<2x1xf32, #tpu.memory_space<vmem>>, vector<2x1xf32>,
    return
  }
}

</mosaic_0001>

<bundles_post_ra>
// kernel: lstm1_forward.1
= control target key start
LH: loop header
LB: loop body
LE: loop exit
PB: predicated region body
PF: predicated region fallthrough
CT: control target
= control target key end

     0   :  { %vm48_vm0 = vcmask 1044480   ;;  %vm41_vm1 = vcmask 39936   ;;  %v133_v3 = vlaneseq  ;;  %vm131_vm2 = vcmask 1040384   ;;  %s624_s13 = smov 4   ;;  %s791_s1 = inlined_call_operand.vmem [shape: f32[5,8], index: 1, kind: input, shape index: {}]   ;;  %s792_s0 = inlined_call_operand.vmem [shape: f32[16,5], index: 0, kind: input, shape index: {}]   ;;  %s793_s2 = inlined_call_operand.vmem [shape: f32[2,8], index: 2, kind: input, shape index: {}]   ;;  %s794_s3 = inlined_call_operand.vmem [shape: f32[1,8], index: 3, kind: input, shape index: {}]   ;;  %s795_s7 = inlined_call_operand.<no memory space> [shape: f32[1,1], index: 7, kind: input, shape index: {}]   ;;  %s796_s4 = inlined_call_operand.vmem [shape: f32[2,128], index: 4, kind: input, shape index: {}]   ;;  %s797_s5 = inlined_call_operand.vmem [shape: f32[1,128], index: 5, kind: input, shape index: {}]   ;;  %s798_s6 = inlined_call_operand.vmem [shape: f32[1,128], index: 6, kind: input, shape index: {}]   ;;  %s799_s8 = inlined_call_operand.vmem [shape: f32[2,1], index: 8, kind: output, shape index: {}]  }
   0x1   :  { %v33_v0 = vld [vmem:[%s791_s1] sm:$0x1f]  ;;  %v32_v2 = vld [vmem:[%s792_s0 + $0x8] sm:$0xff]  ;;  %v622_v51 = vmov 7   ;;  %v623_v52 = vmov 6   ;;  %vm501_vm3 = vcmask 1041408  }
   0x2   :  { %v31_v1 = vld [vmem:[%s792_s0] sm:$0xff]  ;;  %537 = vmatprep.subr.msk.mxu0 %vm48_vm0, %v33_v0  ;;  %v679_v4 = vshrl.u32 %v133_v3, 7  ;;  %548 = vset.pattern.permute.xlu0 %v622_v51  ;;  %vm513_vm4 = vcmask 1024  }
   0x3   :  { %539 = vmatprep.mubr.msk.f32.mxu0 %vm41_vm1, %v31_v1  ;;  %538 = vmatpush3.msk.msra.mxu0 %vm48_vm0, %v33_v0  ;;  %v127_v7 = vld [vmem:[%s793_s2] sm:$0x3]  ;;  %s620_s2 = smov 124  }
   0x4   :  { %540 = vmatmul.mubr.msk.f32.vlgmr.msra.gmra.mrb[0].mxu0 %vm41_vm1, %v32_v2  ;;  %v135_v5 = vsub.s32 0, %v679_v4  ;;  %v140_v6 = vsub.s32 1, %v679_v4  ;;  %v519_v10 = vld [vmem:[%s794_s3] ss:$0 sm:$0xff]  ;;  %s621_s3 = smov 2   ;;  %547 = vset.pattern.permute.xlu1 %v623_v52 }
   0x6   :  { %v688_v8 = vrot.slane %v127_v7, %v135_v5  ;;  %v692_v9 = vrot.slane %v127_v7, %v140_v6 }
   0x8   :  { %v137_v11 = vmul.f32 0.0, %v688_v8  ;;  %v142_v12 = vmul.f32 0.0, %v692_v9 }
   0xa   :  { %v143_v17 = vadd.f32 %v142_v12, %v137_v11 }
  0xd7   :  { %v541_v13 = vpop.f32.mrb[0].mxu0 }
  0xd8   :  { %v124_v14 = vadd.f32 %v541_v13, %v519_v10  ;;  %v118_v15 = vpop.f32.mrb[1].mxu0 }
  0xd9   :  { %v119_v16 = vadd.f32 %v519_v10, %v118_v15 }
  0xda   :  { %v129_v18 = vrot.slane %v124_v14, 7  ;;  %v212_v19 = vrot.slane %v124_v14, 1  ;;  %v254_v20 = vrot.slane %v124_v14, 2  ;;  %v296_v21 = vrot.slane %v124_v14, 3 }
  0xdb   :  { %v170_v22 = vrot.slane %v119_v16, 1  ;;  %v210_v23 = vrot.slane %v119_v16, 2  ;;  %v252_v24 = vrot.slane %v119_v16, 3  ;;  %v294_v25 = vrot.slane %v119_v16, 4 }
  0xdc   :  { %v132_v26 = vsel %vm131_vm2, %v119_v16, %v129_v18  ;;  %v336_v27 = vrot.slane %v119_v16, 5  ;;  %v338_v28 = vrot.slane %v124_v14, 4  ;;  %v378_v29 = vrot.slane %v119_v16, 6 }
  0xdd   :  { %v144_v30 = vadd.f32 %v143_v17, %v132_v26  ;;  %v172_v31 = vsel %vm131_vm2, %v170_v22, %v124_v14  ;;  %v702_v32 = vsel %vm131_vm2, %v210_v23, %v212_v19  ;;  %v705_v33 = vsel %vm131_vm2, %v252_v24, %v254_v20 }
  0xde   :  { %v708_v34 = vsel %vm131_vm2, %v294_v25, %v296_v21  ;;  %v711_v35 = vsel %vm131_vm2, %v336_v27, %v338_v28  ;;  %v380_v36 = vrot.slane %v124_v14, 5  ;;  %v420_v37 = vrot.slane %v119_v16, 7 }
  0xdf   :  { %556 = vtanh.f32 %v144_v30  ;;  %v422_v38 = vrot.slane %v124_v14, 6  ;;  %v523_v42 = vmul.f32 -1.442695, %v144_v30 }
  0xe0   :  { %v714_v39 = vsel %vm131_vm2, %v378_v29, %v380_v36 }
  0xe1   :  { %v717_v40 = vsel %vm131_vm2, %v420_v37, %v422_v38  ;;  %558 = vpow2.f32 %v523_v42 }
  0xe9   :  { %v557_v41 = vpop.eup %556 }
  0xea   :  { %154 = vrot.lane.b32.xlu0 %v557_v41, %s620_s2 }
  0xeb   :  { %v559_v43 = vpop.eup %558 }
  0xec   :  { %v148_v44 = vadd.f32 1.0, %v559_v43 }
  0xee   :  { %560 = vrcp.f32 %v148_v44 }
  0xf8   :  { %v561_v45 = vpop.eup %560 }
  0xf9   :  { %v152_v48 = vmul.f32 0.0, %v561_v45 }
 0x15c   :  { %v155_v46 = vpop.permute.xlu0 %154 }
 0x15d   :  { %v157_v47 = vmul.f32 %v561_v45, %v155_v46 }
 0x15f   :  { %159 = vrot.lane.b32.xlu0 %v157_v47, %s621_s3 }
 0x1d1   :  { %v160_v49 = vpop.permute.xlu0 %159 }
 0x1d2   :  { %v162_v50 = vadd.f32 %v160_v49, %v152_v48 }
 0x1d4   :  { %562 = vtanh.f32 %v162_v50 }
 0x1de   :  { %v563_v53 = vpop.eup %562 }
 0x1df   :  { %165 = vrot.lane.b32.xlu1 %v563_v53, %s624_s13 }
 0x251   :  { %v166_v54 = vpop.permute.xlu1 %165 }
 0x252   :  { %v168_v55 = vmul.f32 %v561_v45, %v166_v54 }
 0x254   :  { %180 = vperm.xlu0 %548, %v168_v55   ;;  %175 = vperm.xlu1 %547, %v168_v55  }
 0x2d3   :  { %v181_v56 = vpop.permute.xlu0 %180  ;;  %v176_v57 = vpop.permute.xlu1 %175 }
 0x2d4   :  { %v183_v58 = vmul.f32 %v181_v56, %v692_v9  ;;  %v178_v59 = vmul.f32 %v176_v57, %v688_v8 }
 0x2d6   :  { %v184_v60 = vadd.f32 %v183_v58, %v178_v59 }
 0x2d8   :  { %v185_v61 = vadd.f32 %v184_v60, %v172_v31 }
 0x2da   :  { %564 = vtanh.f32 %v185_v61  ;;  %v524_v63 = vmul.f32 -1.442695, %v185_v61 }
 0x2dc   :  { %566 = vpow2.f32 %v524_v63 }
 0x2e4   :  { %v565_v62 = vpop.eup %564 }
 0x2e5   :  { %195 = vrot.lane.b32.xlu1 %v565_v62, %s620_s2 }
 0x2e6   :  { %v567_v0 = vpop.eup %566 }
 0x2e7   :  { %v189_v1 = vadd.f32 1.0, %v567_v0 }
 0x2e9   :  { %568 = vrcp.f32 %v189_v1 }
 0x2f3   :  { %v569_v2 = vpop.eup %568 }
 0x2f4   :  { %v193_v10 = vmul.f32 %v569_v2, %v162_v50 }
 0x357   :  { %v196_v3 = vpop.permute.xlu1 %195 }
 0x358   :  { %v198_v7 = vmul.f32 %v569_v2, %v196_v3 }
 0x35a   :  { %200 = vrot.lane.b32.xlu1 %v198_v7, %s621_s3 }
 0x3cc   :  { %v201_v11 = vpop.permute.xlu1 %200 }
 0x3cd   :  { %v203_v12 = vadd.f32 %v201_v11, %v193_v10 }
 0x3cf   :  { %570 = vtanh.f32 %v203_v12 }
 0x3d9   :  { %v571_v13 = vpop.eup %570 }
 0x3da   :  { %206 = vrot.lane.b32.xlu0 %v571_v13, %s624_s13 }
 0x44c   :  { %v207_v14 = vpop.permute.xlu0 %206 }
 0x44d   :  { %v209_v15 = vmul.f32 %v569_v2, %v207_v14 }
 0x44f   :  { %222 = vperm.xlu0 %548, %v209_v15   ;;  %217 = vperm.xlu1 %547, %v209_v15  }
 0x453   :  { %549 = vset.pattern.permute.xlu0 %v623_v52  ;;  %550 = vset.pattern.permute.xlu1 %v622_v51 }
 0x4ce   :  { %v223_v16 = vpop.permute.xlu0 %222  ;;  %v218_v17 = vpop.permute.xlu1 %217 }
 0x4cf   :  { %v225_v18 = vmul.f32 %v223_v16, %v692_v9  ;;  %v220_v19 = vmul.f32 %v218_v17, %v688_v8 }
 0x4d1   :  { %v226_v20 = vadd.f32 %v225_v18, %v220_v19 }
 0x4d3   :  { %v227_v21 = vadd.f32 %v226_v20, %v702_v32 }
 0x4d5   :  { %572 = vtanh.f32 %v227_v21  ;;  %v525_v23 = vmul.f32 -1.442695, %v227_v21 }
 0x4d7   :  { %574 = vpow2.f32 %v525_v23 }
 0x4df   :  { %v573_v22 = vpop.eup %572 }
 0x4e0   :  { %237 = vrot.lane.b32.xlu1 %v573_v22, %s620_s2 }
 0x4e1   :  { %v575_v24 = vpop.eup %574 }
 0x4e2   :  { %v231_v25 = vadd.f32 1.0, %v575_v24 }
 0x4e4   :  { %576 = vrcp.f32 %v231_v25 }
 0x4ee   :  { %v577_v26 = vpop.eup %576 }
 0x4ef   :  { %v235_v29 = vmul.f32 %v577_v26, %v203_v12 }
 0x552   :  { %v238_v27 = vpop.permute.xlu1 %237 }
 0x553   :  { %v240_v28 = vmul.f32 %v577_v26, %v238_v27 }
 0x555   :  { %242 = vrot.lane.b32.xlu0 %v240_v28, %s621_s3 }
 0x5c7   :  { %v243_v30 = vpop.permute.xlu0 %242 }
 0x5c8   :  { %v245_v31 = vadd.f32 %v243_v30, %v235_v29 }
 0x5ca   :  { %578 = vtanh.f32 %v245_v31 }
 0x5d4   :  { %v579_v36 = vpop.eup %578 }
 0x5d5   :  { %248 = vrot.lane.b32.xlu1 %v579_v36, %s624_s13 }
 0x647   :  { %v249_v32 = vpop.permute.xlu1 %248 }
 0x648   :  { %v251_v37 = vmul.f32 %v577_v26, %v249_v32 }
 0x64a   :  { %264 = vperm.xlu1 %550, %v251_v37   ;;  %259 = vperm.xlu0 %549, %v251_v37  }
 0x6c9   :  { %v265_v38 = vpop.permute.xlu1 %264  ;;  %v260_v41 = vpop.permute.xlu0 %259 }
 0x6ca   :  { %v267_v42 = vmul.f32 %v265_v38, %v692_v9  ;;  %v262_v43 = vmul.f32 %v260_v41, %v688_v8 }
 0x6cc   :  { %v268_v44 = vadd.f32 %v267_v42, %v262_v43 }
 0x6ce   :  { %v269_v45 = vadd.f32 %v268_v44, %v705_v33 }
 0x6d0   :  { %580 = vtanh.f32 %v269_v45  ;;  %v526_v47 = vmul.f32 -1.442695, %v269_v45 }
 0x6d2   :  { %582 = vpow2.f32 %v526_v47 }
 0x6da   :  { %v581_v46 = vpop.eup %580 }
 0x6db   :  { %279 = vrot.lane.b32.xlu1 %v581_v46, %s620_s2 }
 0x6dc   :  { %v583_v48 = vpop.eup %582 }
 0x6dd   :  { %v273_v49 = vadd.f32 1.0, %v583_v48 }
 0x6df   :  { %584 = vrcp.f32 %v273_v49 }
 0x6e9   :  { %v585_v50 = vpop.eup %584 }
 0x6ea   :  { %v277_v55 = vmul.f32 %v585_v50, %v245_v31 }
 0x74d   :  { %v280_v53 = vpop.permute.xlu1 %279 }
 0x74e   :  { %v282_v54 = vmul.f32 %v585_v50, %v280_v53 }
 0x750   :  { %284 = vrot.lane.b32.xlu0 %v282_v54, %s621_s3 }
 0x7c2   :  { %v285_v56 = vpop.permute.xlu0 %284 }
 0x7c3   :  { %v287_v57 = vadd.f32 %v285_v56, %v277_v55 }
 0x7c5   :  { %586 = vtanh.f32 %v287_v57 }
 0x7cf   :  { %v587_v58 = vpop.eup %586 }
 0x7d0   :  { %290 = vrot.lane.b32.xlu1 %v587_v58, %s624_s13 }
 0x842   :  { %v291_v33 = vpop.permute.xlu1 %290 }
 0x843   :  { %v293_v59 = vmul.f32 %v585_v50, %v291_v33 }
 0x845   :  { %306 = vperm.xlu1 %550, %v293_v59   ;;  %301 = vperm.xlu0 %549, %v293_v59  }
 0x849   :  { %551 = vset.pattern.permute.xlu1 %v623_v52  ;;  %552 = vset.pattern.permute.xlu0 %v622_v51 }
 0x8c4   :  { %v307_v60 = vpop.permute.xlu1 %306  ;;  %v302_v61 = vpop.permute.xlu0 %301 }
 0x8c5   :  { %v309_v62 = vmul.f32 %v307_v60, %v692_v9  ;;  %v304_v63 = vmul.f32 %v302_v61, %v688_v8 }
 0x8c7   :  { %v310_v0 = vadd.f32 %v309_v62, %v304_v63 }
 0x8c9   :  { %v311_v1 = vadd.f32 %v310_v0, %v708_v34 }
 0x8cb   :  { %588 = vtanh.f32 %v311_v1  ;;  %v527_v3 = vmul.f32 -1.442695, %v311_v1 }
 0x8cd   :  { %590 = vpow2.f32 %v527_v3 }
 0x8d5   :  { %v589_v2 = vpop.eup %588 }
 0x8d6   :  { %321 = vrot.lane.b32.xlu0 %v589_v2, %s620_s2 }
 0x8d7   :  { %v591_v7 = vpop.eup %590 }
 0x8d8   :  { %v315_v10 = vadd.f32 1.0, %v591_v7 }
 0x8da   :  { %592 = vrcp.f32 %v315_v10 }
 0x8e4   :  { %v593_v11 = vpop.eup %592 }
 0x8e5   :  { %v319_v14 = vmul.f32 %v593_v11, %v287_v57 }
 0x948   :  { %v322_v12 = vpop.permute.xlu0 %321 }
 0x949   :  { %v324_v13 = vmul.f32 %v593_v11, %v322_v12 }
 0x94b   :  { %326 = vrot.lane.b32.xlu1 %v324_v13, %s621_s3 }
 0x9bd   :  { %v327_v15 = vpop.permute.xlu1 %326 }
 0x9be   :  { %v329_v16 = vadd.f32 %v327_v15, %v319_v14 }
 0x9c0   :  { %594 = vtanh.f32 %v329_v16 }
 0x9ca   :  { %v595_v17 = vpop.eup %594 }
 0x9cb   :  { %332 = vrot.lane.b32.xlu0 %v595_v17, %s624_s13 }
 0xa3d   :  { %v333_v34 = vpop.permute.xlu0 %332 }
 0xa3e   :  { %v335_v18 = vmul.f32 %v593_v11, %v333_v34  ;;  %v13_v34 = vstv %s795_s7 }
 0xa3f   :  { %14 = vst [vmem:[#allocation2] sm:$0x1] %v13_v34 }
 0xa40   :  { %348 = vperm.xlu0 %552, %v335_v18   ;;  %343 = vperm.xlu1 %551, %v335_v18   ;;  %v463_v18 = vld [vmem:[%s796_s4] sm:$0x3] }
 0xa46   :  { %v533_v4 = vld [vmem:[#allocation2] ss:$0 sm:$0xff] }
 0xabf   :  { %v349_v19 = vpop.permute.xlu0 %348  ;;  %v344_v20 = vpop.permute.xlu1 %343 }
 0xac0   :  { %v351_v21 = vmul.f32 %v349_v19, %v692_v9  ;;  %v346_v22 = vmul.f32 %v344_v20, %v688_v8  ;;  %v481_v19 = vrot.slane %v463_v18, %v140_v6  ;;  %v472_v20 = vrot.slane %v463_v18, %v135_v5 }
 0xac2   :  { %v352_v23 = vadd.f32 %v351_v21, %v346_v22 }
 0xac4   :  { %v353_v24 = vadd.f32 %v352_v23, %v711_v35 }
 0xac6   :  { %596 = vtanh.f32 %v353_v24  ;;  %v528_v26 = vmul.f32 -1.442695, %v353_v24 }
 0xac8   :  { %598 = vpow2.f32 %v528_v26 }
 0xad0   :  { %v597_v25 = vpop.eup %596 }
 0xad1   :  { %363 = vrot.lane.b32.xlu1 %v597_v25, %s620_s2 }
 0xad2   :  { %v599_v27 = vpop.eup %598 }
 0xad3   :  { %v357_v28 = vadd.f32 1.0, %v599_v27  ;;  %v532_v27 = vld [vmem:[%s798_s6] ss:$0 sm:$0xff] }
 0xad5   :  { %600 = vrcp.f32 %v357_v28 }
 0xadf   :  { %v601_v29 = vpop.eup %600 }
 0xae0   :  { %v361_v36 = vmul.f32 %v601_v29, %v329_v16 }
 0xb43   :  { %v364_v30 = vpop.permute.xlu1 %363 }
 0xb44   :  { %v366_v31 = vmul.f32 %v601_v29, %v364_v30 }
 0xb46   :  { %368 = vrot.lane.b32.xlu1 %v366_v31, %s621_s3 }
 0xbb8   :  { %v369_v32 = vpop.permute.xlu1 %368 }
 0xbb9   :  { %v371_v37 = vadd.f32 %v369_v32, %v361_v36 }
 0xbbb   :  { %602 = vtanh.f32 %v371_v37 }
 0xbc5   :  { %v603_v38 = vpop.eup %602 }
 0xbc6   :  { %374 = vrot.lane.b32.xlu0 %v603_v38, %s624_s13 }
 0xc38   :  { %v375_v35 = vpop.permute.xlu0 %374 }
 0xc39   :  { %v377_v41 = vmul.f32 %v601_v29, %v375_v35 }
 0xc3b   :  { %390 = vperm.xlu0 %552, %v377_v41   ;;  %385 = vperm.xlu1 %551, %v377_v41  }
 0xc3f   :  { %553 = vset.pattern.permute.xlu0 %v623_v52  ;;  %554 = vset.pattern.permute.xlu1 %v622_v51 }
 0xcba   :  { %v391_v42 = vpop.permute.xlu0 %390  ;;  %v386_v43 = vpop.permute.xlu1 %385 }
 0xcbb   :  { %v393_v44 = vmul.f32 %v391_v42, %v692_v9  ;;  %v388_v45 = vmul.f32 %v386_v43, %v688_v8 }
 0xcbd   :  { %v394_v46 = vadd.f32 %v393_v44, %v388_v45 }
 0xcbf   :  { %v395_v47 = vadd.f32 %v394_v46, %v714_v39 }
 0xcc1   :  { %604 = vtanh.f32 %v395_v47  ;;  %v529_v49 = vmul.f32 -1.442695, %v395_v47 }
 0xcc3   :  { %606 = vpow2.f32 %v529_v49 }
 0xccb   :  { %v605_v48 = vpop.eup %604 }
 0xccc   :  { %405 = vrot.lane.b32.xlu1 %v605_v48, %s620_s2 }
 0xccd   :  { %v607_v50 = vpop.eup %606 }
 0xcce   :  { %v399_v53 = vadd.f32 1.0, %v607_v50 }
 0xcd0   :  { %608 = vrcp.f32 %v399_v53 }
 0xcda   :  { %v609_v52 = vpop.eup %608 }
 0xcdb   :  { %v403_v56 = vmul.f32 %v609_v52, %v371_v37 }
 0xd3e   :  { %v406_v54 = vpop.permute.xlu1 %405 }
 0xd3f   :  { %v408_v55 = vmul.f32 %v609_v52, %v406_v54 }
 0xd41   :  { %410 = vrot.lane.b32.xlu0 %v408_v55, %s621_s3 }
 0xdb3   :  { %v411_v57 = vpop.permute.xlu0 %410 }
 0xdb4   :  { %v413_v58 = vadd.f32 %v411_v57, %v403_v56 }
 0xdb6   :  { %610 = vtanh.f32 %v413_v58 }
 0xdc0   :  { %v611_v33 = vpop.eup %610 }
 0xdc1   :  { %416 = vrot.lane.b32.xlu1 %v611_v33, %s624_s13 }
 0xe33   :  { %v417_v39 = vpop.permute.xlu1 %416 }
 0xe34   :  { %v419_v59 = vmul.f32 %v609_v52, %v417_v39 }
 0xe36   :  { %432 = vperm.xlu1 %554, %v419_v59   ;;  %427 = vperm.xlu0 %553, %v419_v59  }
 0xeb5   :  { %v433_v60 = vpop.permute.xlu1 %432  ;;  %v428_v61 = vpop.permute.xlu0 %427 }
 0xeb6   :  { %v435_v62 = vmul.f32 %v433_v60, %v692_v9  ;;  %v430_v63 = vmul.f32 %v428_v61, %v688_v8 }
 0xeb8   :  { %v436_v0 = vadd.f32 %v435_v62, %v430_v63 }
 0xeba   :  { %v437_v1 = vadd.f32 %v436_v0, %v717_v40 }
 0xebc   :  { %612 = vtanh.f32 %v437_v1  ;;  %v530_v3 = vmul.f32 -1.442695, %v437_v1 }
 0xebe   :  { %614 = vpow2.f32 %v530_v3 }
 0xec6   :  { %v613_v2 = vpop.eup %612 }
 0xec7   :  { %447 = vrot.lane.b32.xlu1 %v613_v2, %s620_s2 }
 0xec8   :  { %v615_v7 = vpop.eup %614 }
 0xec9   :  { %v441_v10 = vadd.f32 1.0, %v615_v7 }
 0xecb   :  { %616 = vrcp.f32 %v441_v10 }
 0xed5   :  { %v617_v11 = vpop.eup %616 }
 0xed6   :  { %v445_v9 = vmul.f32 %v617_v11, %v413_v58 }
 0xf39   :  { %v448_v12 = vpop.permute.xlu1 %447 }
 0xf3a   :  { %v450_v13 = vmul.f32 %v617_v11, %v448_v12 }
 0xf3c   :  { %452 = vrot.lane.b32.xlu0 %v450_v13, %s621_s3 }
 0xfae   :  { %v453_v14 = vpop.permute.xlu0 %452 }
 0xfaf   :  { %v455_v8 = vadd.f32 %v453_v14, %v445_v9 }
 0xfb1   :  { %618 = vtanh.f32 %v455_v8 }
 0xfbb   :  { %v619_v15 = vpop.eup %618 }
 0xfbc   :  { %458 = vrot.lane.b32.xlu1 %v619_v15, %s624_s13 }
0x102e   :  { %v459_v40 = vpop.permute.xlu1 %458 }
0x102f   :  { %v461_v16 = vmul.f32 %v617_v11, %v459_v40 }
0x1031   :  { %v462_v17 = vmax.f32 %v461_v16, 0.0 }
0x1033   :  { %475 = vperm.xlu1 %554, %v462_v17   ;;  %466 = vperm.xlu0 %553, %v462_v17  }
0x1037   :  { %555 = vset.pattern.permute.xlu0 %v622_v51  ;;  %v531_v51 = vld [vmem:[%s797_s5] ss:$0 sm:$0xff] }
0x10b2   :  { %v476_v21 = vpop.permute.xlu1 %475  ;;  %v467_v22 = vpop.permute.xlu0 %466 }
0x10b3   :  { %v482_v23 = vmul.f32 %v481_v19, %v476_v21  ;;  %v473_v24 = vmul.f32 %v472_v20, %v467_v22 }
0x10b5   :  { %v483_v25 = vadd.f32 %v482_v23, %v473_v24 }
0x10b7   :  { %v491_v26 = vadd.f32 %v531_v51, %v483_v25 }
0x10b9   :  { %v492_v28 = vmax.f32 %v491_v26, 0.0 }
0x10bb   :  { %v500_v6 = vmul.f32 %v532_v27, %v492_v28 }
0x10bd   :  { %v502_v29 = vsel %vm501_vm3, %v500_v6, 0.0 }
0x10be   :  { %503 = vadd.xlane.f32.xlu0 %v502_v29 }
0x114b   :  { %v504_v5 = vpop.xlane.xlu0 %503 }
0x114c   :  { %v512_v30 = vadd.f32 %v533_v4, %v504_v5 }
0x114e   :  { %514 = vst.msk [vmem:[%s799_s8] sm:$0x3] %vm513_vm4, %v512_v30 }

</bundles_post_ra>
